<compile_context>
chip_gen: v6e
topology: v6e:2x2x1
jax: 0.10.0
libtpu: 0.0.40
codegen_flags: <defaults>
</compile_context>

<pallas_src>
import functools

import jax
import jax.numpy as jnp
from jax.experimental import pallas as pl
from jax.experimental.pallas import tpu as pltpu


# ---------------------------------------------------------------------------
# Kernels
# ---------------------------------------------------------------------------

def _single_block_matmul_kernel(x_ref, w_ref, o_ref):
    """Whole problem in VMEM: one MXU dot, no grid, no pipelining."""
    x = x_ref[...]
    w = w_ref[...]
    if x.dtype != w.dtype:          # bf16 weights: cast activations on the VPU
        x = x.astype(w.dtype)
    o_ref[...] = jnp.dot(
        x, w, preferred_element_type=jnp.float32
    ).astype(o_ref.dtype)


def _single_block_softmax_matmul_kernel(logits_ref, w_ref, o_ref):
    """Fused producer: softmax on the VPU/EUP, then one MXU dot."""
    logits = logits_ref[...].astype(jnp.float32)
    m = jnp.max(logits, axis=-1, keepdims=True)
    e = jnp.exp(logits - m)
    p = e / jnp.sum(e, axis=-1, keepdims=True)
    w = w_ref[...]
    if p.dtype != w.dtype:
        p = p.astype(w.dtype)
    o_ref[...] = jnp.dot(
        p, w, preferred_element_type=jnp.float32
    ).astype(o_ref.dtype)


def _matmul_noreduce_kernel(x_ref, w_ref, o_ref):
    """grid = (M//tm, N//tn); the whole K dimension lives in one block."""
    x = x_ref[...]
    w = w_ref[...]
    if x.dtype != w.dtype:
        x = x.astype(w.dtype)
    o_ref[...] = jnp.dot(
        x, w, preferred_element_type=jnp.float32
    ).astype(o_ref.dtype)


def _matmul_kreduce_kernel(x_ref, w_ref, o_ref, acc_ref):
    """grid = (M//tm, N//tn, K//tk); K is the reduction axis (last, arbitrary)."""
    @pl.when(pl.program_id(2) == 0)
    def _():
        acc_ref[...] = jnp.zeros_like(acc_ref)

    x = x_ref[...]
    w = w_ref[...]
    if x.dtype != w.dtype:
        x = x.astype(w.dtype)
    acc_ref[...] += jnp.dot(x, w, preferred_element_type=jnp.float32)

    @pl.when(pl.program_id(2) == pl.num_programs(2) - 1)
    def _():
        o_ref[...] = acc_ref[...].astype(o_ref.dtype)


# ---------------------------------------------------------------------------
# Helpers
# ---------------------------------------------------------------------------

def _round_up(x, m):
    return ((x + m - 1) // m) * m


def _pick_tile(dim, tile_max, granule):
    """Largest tile <= tile_max: the full dim if it fits, else the largest
    granule-multiple that divides dim exactly (no padding), else a plain
    granule-multiple (padding fallback)."""
    if dim <= tile_max:
        return dim
    t = (tile_max // granule) * granule
    fallback = max(granule, t)
    while t >= granule:
        if dim % t == 0:
            return t
        t -= granule
    return fallback


def _matmul_2d(x, w, tm_max, tn_max, tk_max, max_single_block_vmem_bytes):
    """x: [M, K], w: [K, N] -> [M, N] on the MXU."""
    M, K = x.shape
    K2, N = w.shape
    assert K == K2, "inner dimensions must match"
    out_dtype = x.dtype

    x_item = x.dtype.itemsize
    w_item = w.dtype.itemsize
    o_item = jnp.dtype(out_dtype).itemsize

    bytes_accessed = M * K * x_item + K * N * w_item + M * N * o_item
    cost = pl.CostEstimate(
        flops=2 * M * K * N, transcendentals=0, bytes_accessed=bytes_accessed
    )

    # ---- Fast path: whole problem in one VMEM block, grid-less call --------
    # Footprint counts a 2x buffering factor so the budget is honest against
    # v7x's 64 MiB physical VMEM.
    if 2 * bytes_accessed <= max_single_block_vmem_bytes:
        return pl.pallas_call(
            _single_block_matmul_kernel,
            out_shape=jax.ShapeDtypeStruct((M, N), out_dtype),
            cost_estimate=cost,
        )(x, w)

    # ---- General tiled path -------------------------------------------------
    tm = _pick_tile(M, tm_max, 8)

    # v7x has 2 TensorCores sharing "parallel" grid axes: if M fits one block,
    # cap tn so N splits into >= 2 blocks and both cores get work.
    tn_cap = tn_max
    if M <= tm_max and N >= 256:
        tn_cap = min(tn_max, max(128, ((N // 2) // 128) * 128))
    tn = _pick_tile(N, tn_cap, 128)
    tk = _pick_tile(K, tk_max, 128)

    Mp, Np, Kp = _round_up(M, tm), _round_up(N, tn), _round_up(K, tk)
    # Padding the small [M, K] activation is cheap.  Padding the weights is the
    # rare fallback (only when K / N have no 128-multiple divisor <= tile_max);
    # common power-of-two shapes never touch the weights in HBM pre-kernel.
    if (Mp, Kp) != (M, K):
        x = jnp.pad(x, ((0, Mp - M), (0, Kp - K)))
    if (Kp, Np) != (K, N):
        w = jnp.pad(w, ((0, Kp - K), (0, Np - N)))

    vmem_bytes = (2 * (tm * tk * x_item + tk * tn * w_item + tm * tn * o_item)
                  + tm * tn * 4)
    vmem_limit = min(max(vmem_bytes + (8 << 20), 32 << 20), 48 << 20)

    if Kp == tk:
        # No reduction axis needed: 2-D grid, no accumulator, no phase gates.
        out_p = pl.pallas_call(
            _matmul_noreduce_kernel,
            out_shape=jax.ShapeDtypeStruct((Mp, Np), out_dtype),
            grid_spec=pltpu.PrefetchScalarGridSpec(
                num_scalar_prefetch=0,
                grid=(Mp // tm, Np // tn),
                in_specs=[
                    pl.BlockSpec((tm, tk), lambda i, j: (i, 0)),
                    pl.BlockSpec((tk, tn), lambda i, j: (0, j)),
                ],
                out_specs=pl.BlockSpec((tm, tn), lambda i, j: (i, j)),
            ),
            compiler_params=pltpu.CompilerParams(
                dimension_semantics=("parallel", "parallel"),
                vmem_limit_bytes=vmem_limit,
            ),
            cost_estimate=cost,
        )(x, w)
    else:
        # K too large for one block: 3-D grid with f32 accumulator, K last.
        out_p = pl.pallas_call(
            _matmul_kreduce_kernel,
            out_shape=jax.ShapeDtypeStruct((Mp, Np), out_dtype),
            grid_spec=pltpu.PrefetchScalarGridSpec(
                num_scalar_prefetch=0,
                grid=(Mp // tm, Np // tn, Kp // tk),
                in_specs=[
                    pl.BlockSpec((tm, tk), lambda i, j, k: (i, k)),
                    pl.BlockSpec((tk, tn), lambda i, j, k: (k, j)),
                ],
                out_specs=pl.BlockSpec((tm, tn), lambda i, j, k: (i, j)),
                scratch_shapes=[pltpu.VMEM((tm, tn), jnp.float32)],
            ),
            compiler_params=pltpu.CompilerParams(
                dimension_semantics=("parallel", "parallel", "arbitrary"),
                vmem_limit_bytes=vmem_limit,
            ),
            cost_estimate=cost,
        )(x, w)

    if (Mp, Np) != (M, N):
        out_p = out_p[:M, :N]
    return out_p


# ---------------------------------------------------------------------------
# Public wrappers
# ---------------------------------------------------------------------------

@functools.partial(
    jax.jit,
    static_argnames=("tm_max", "tn_max", "tk_max", "max_single_block_vmem_bytes"),
)
def multi_action_embedding(
    probability_vectors,
    embeddings,
    *,
    tm_max=256,
    tn_max=512,
    tk_max=1024,
    max_single_block_vmem_bytes=12 * 1024 * 1024,
):
    """embedded = probability_vectors @ embeddings (module-equivalent forward).

    Leading dims of `probability_vectors` are folded into M so timesteps /
    heads batch into one MXU call.
    """
    lead = probability_vectors.shape[:-1]
    K = probability_vectors.shape[-1]
    x2d = probability_vectors.reshape((-1, K))
    N = embeddings.shape[-1]
    out2d = _matmul_2d(
        x2d, embeddings, tm_max, tn_max, tk_max, max_single_block_vmem_bytes
    )
    return out2d.reshape(lead + (N,))


@functools.partial(
    jax.jit,
    static_argnames=("tm_max", "tn_max", "tk_max", "max_single_block_vmem_bytes"),
)
def multi_action_embedding_from_logits(
    logits,
    embeddings,
    *,
    tm_max=256,
    tn_max=512,
    tk_max=1024,
    max_single_block_vmem_bytes=12 * 1024 * 1024,
):
    """Fused producer path: softmax(logits) @ embeddings in one kernel.

    Saves one HBM round trip of the [batch, num_actions] probability tensor on
    the launch/DMA-bound real-shape path.
    """
    lead = logits.shape[:-1]
    K = logits.shape[-1]
    x2d = logits.reshape((-1, K))
    M = x2d.shape[0]
    Kw, N = embeddings.shape
    assert K == Kw, "inner dimensions must match"

    x_item = x2d.dtype.itemsize
    w_item = embeddings.dtype.itemsize
    bytes_accessed = M * K * x_item + K * N * w_item + M * N * 4

    if 2 * bytes_accessed <= max_single_block_vmem_bytes:
        out2d = pl.pallas_call(
            _single_block_softmax_matmul_kernel,
            out_shape=jax.ShapeDtypeStruct((M, N), jnp.float32),
            cost_estimate=pl.CostEstimate(
                flops=2 * M * K * N + 4 * M * K,
                transcendentals=M * K,
                bytes_accessed=bytes_accessed,
            ),
        )(x2d, embeddings)
    else:
        # Large shapes: let XLA fuse the softmax, then use the tiled matmul.
        probs = jax.nn.softmax(x2d.astype(jnp.float32), axis=-1)
        out2d = _matmul_2d(
            probs, embeddings, tm_max, tn_max, tk_max, max_single_block_vmem_bytes
        )
    return out2d.reshape(lead + (N,))


def init_embeddings(key, num_actions, embedding_dim, dtype=jnp.float32):
    """xavier_uniform_ equivalent for the (num_actions, emb_dim) parameter.

    Pass dtype=jnp.bfloat16 to cast the weights once at init (halves weight
    DMA bytes; native MXU dtype on all TPU generations).
    """
    bound = (6.0 / (num_actions + embedding_dim)) ** 0.5
    emb = jax.random.uniform(
        key, (num_actions, embedding_dim), dtype=jnp.float32,
        minval=-bound, maxval=bound,
    )
    return emb.astype(dtype)


# ---------------------------------------------------------------------------
# Self-test
# ---------------------------------------------------------------------------

if __name__ == "__main__":
    # Shapes consistent with the module's forward:
    #   probability_vectors: [batch, num_actions]
    #   embeddings:          [num_actions, embedding_dim]
    batch = 8
    num_actions = 256
    embedding_dim = 128

    key = jax.random.PRNGKey(0)
    k_emb, k_logits, k_gen = jax.random.split(key, 3)

    embeddings = init_embeddings(k_emb, num_actions, embedding_dim)
    logits = jax.random.normal(k_logits, (batch, num_actions), dtype=jnp.float32)
    probability_vectors = jax.nn.softmax(logits, axis=-1)
    ref = probability_vectors @ embeddings

    # 1) Module-equivalent forward: single grid-less VMEM block, one MXU dot.
    out = jax.block_until_ready(multi_action_embedding(probability_vectors, embeddings))
    assert out.shape == (batch, embedding_dim)
    assert jnp.allclose(out, ref, atol=1e-5, rtol=1e-5)

    # 2) Leading batch dims folded into M ([2, 4, A] -> [2, 4, E]).
    probs3 = probability_vectors.reshape(2, 4, num_actions)
    out3 = jax.block_until_ready(multi_action_embedding(probs3, embeddings))
    assert out3.shape == (2, 4, embedding_dim)
    assert jnp.allclose(out3.reshape(batch, embedding_dim), ref, atol=1e-5, rtol=1e-5)

    # 3) Fused softmax + matmul straight from logits (saves one HBM round trip).
    out_fused = jax.block_until_ready(
        multi_action_embedding_from_logits(logits, embeddings))
    assert out_fused.shape == (batch, embedding_dim)
    assert jnp.allclose(out_fused, ref, atol=1e-4, rtol=1e-4)

    # 4) bf16 weights cast once at init, f32 accumulation inside the kernel.
    emb_bf16 = init_embeddings(k_emb, num_actions, embedding_dim, dtype=jnp.bfloat16)
    out_bf16 = jax.block_until_ready(
        multi_action_embedding(probability_vectors, emb_bf16))
    ref_bf16 = probability_vectors @ emb_bf16.astype(jnp.float32)
    assert jnp.allclose(out_bf16, ref_bf16, atol=1e-3, rtol=1e-2)

    # 5) General tiled path, divisor tiles (no weight padding) + M padding +
    #    K-reduction grid, forced at small scale by tiny tile caps.
    x5 = jax.nn.softmax(jax.random.normal(k_gen, (10, 384), jnp.float32), axis=-1)
    w5 = init_embeddings(jax.random.PRNGKey(1), 384, 256)
    out5 = jax.block_until_ready(multi_action_embedding(
        x5, w5, tm_max=8, tn_max=128, tk_max=128, max_single_block_vmem_bytes=0))
    assert out5.shape == (10, 256)
    assert jnp.allclose(out5, x5 @ w5, atol=1e-5, rtol=1e-5)

    # 6) Rare fallback: dims with no 128-multiple divisor -> weight padding path.
    x6 = jax.nn.softmax(jax.random.normal(jax.random.PRNGKey(2), (10, 300), jnp.float32), axis=-1)
    w6 = init_embeddings(jax.random.PRNGKey(3), 300, 200)
    out6 = jax.block_until_ready(multi_action_embedding(
        x6, w6, tm_max=8, tn_max=128, tk_max=128, max_single_block_vmem_bytes=0))
    assert out6.shape == (10, 200)
    assert jnp.allclose(out6, x6 @ w6, atol=1e-5, rtol=1e-5)

    print("KERNEL_OK")
</pallas_src>

<mosaic_0001>
module attributes {stable_mosaic.version = 11 : i64} {
  func.func @_single_block_matmul_kernel(%arg0: memref<8x256xf32, #tpu.memory_space<vmem>>, %arg1: memref<256x128xf32, #tpu.memory_space<vmem>>, %arg2: memref<8x128xf32, #tpu.memory_space<vmem>>) attributes {dimension_semantics = [], scalar_prefetch = 0 : i64, scratch_operands = 0 : i64, tpu.core_type = #tpu.core_type<tc>} {
    %c0 = arith.constant 0 : index
    %c0_0 = arith.constant 0 : index
    %0 = vector.load %arg0[%c0, %c0_0] : memref<8x256xf32, #tpu.memory_space<vmem>>, vector<8x256xf32>
    %c0_1 = arith.constant 0 : index
    %c0_2 = arith.constant 0 : index
    %1 = vector.load %arg1[%c0_1, %c0_2] : memref<256x128xf32, #tpu.memory_space<vmem>>, vector<256x128xf32>
    %cst = arith.constant dense<0.000000e+00> : vector<8x128xf32>
    %2 = tpu.matmul %0, %1, %cst {dimension_numbers = #tpu.dot_dimension_numbers<[1], [0], [0], [1], [0, 0, 1, 1], [], []>} : vector<8x256xf32>, vector<256x128xf32>, vector<8x128xf32> -> vector<8x128xf32>
    %c0_3 = arith.constant 0 : index
    %c0_4 = arith.constant 0 : index
    %3 = vector.load %arg2[%c0_3, %c0_4] : memref<8x128xf32, #tpu.memory_space<vmem>>, vector<8x128xf32>
    tpu.vector_store %arg2[%c0_3, %c0_4], %2 {strides = array<i32>} : memref<8x128xf32, #tpu.memory_space<vmem>>, vector<8x128xf32>,
    return
  }
}

</mosaic_0001>

<bundles_post_ra>
// kernel: multi_action_embedding.1
= control target key start
LH: loop header
LB: loop body
LE: loop exit
PB: predicated region body
PF: predicated region fallthrough
CT: control target
= control target key end

     0   :  { %7 = vsyncpa [#allocation3], 0  ;;  %s294_s0 = inlined_call_operand.hbm [shape: f32[8,256], index: 0, kind: input, shape index: {}]   ;;  %s295_s1 = inlined_call_operand.hbm [shape: f32[256,128], index: 1, kind: input, shape index: {}]   ;;  %s296_s2 = inlined_call_operand.hbm [shape: f32[8,128], index: 2, kind: output, shape index: {}]  }
   0x1   :  { %8 = vsyncpa [#allocation6], 0 }
   0x2   :  { %9 = vsyncpa [#allocation4], 0  ;;  %s265_s9 = smov [#allocation2]   ;;  %s266_s11 = smov [#allocation5]  }
   0x3   :  { %s16_s10 = sshll.u32 %s265_s9, 4  ;;  %s25_s12 = sshll.u32 %s266_s11, 4  ;;  %s17_s10 = int_to_ptr.vmem [resolvable:$true] %s16_s10  ;;  %s26_s12 = int_to_ptr.vmem [resolvable:$true] %s25_s12 }
   0x4   :  { %s207_s13 = scalar_lea.vmem %s17_s10, 256  ;;  %p212_p1 = scmp.lt.s32.totalorder %s17_s10, %s17_s10 }
   0x5   :  { %p208_p0 = scmp.ne.s32.totalorder %s17_s10, %s207_s13  ;;  %p213_p2 = scmp.lt.s32.totalorder %s207_s13, %s207_s13 }
   0x7   :  { %p214_p3 = por %p213_p2, %p212_p1 }
   0x9   :  { %p215_p4 = pnand %p214_p3, %p208_p0 }
   0xb   :  { %218 = shalt.err (!%p215_p4)
}
   0xc   :  { %19 = dma.hbm_to_vmem [thread:$0]  %s294_s0, 256, %s17_s10, [#allocation3]  }
   0xd   :  { %s227_s16 = scalar_lea.vmem %s26_s12, 4096  ;;  %p232_p6 = scmp.lt.s32.totalorder %s26_s12, %s26_s12 }
   0xe   :  { %p228_p5 = scmp.ne.s32.totalorder %s26_s12, %s227_s16  ;;  %p233_p7 = scmp.lt.s32.totalorder %s227_s16, %s227_s16 }
  0x10   :  { %p234_p8 = por %p233_p7, %p232_p6 }
  0x12   :  { %p235_p9 = pnand %p234_p8, %p228_p5 }
  0x14   :  { %238 = shalt.err (!%p235_p9)
}
  0x15   :  { %s267_s17 = smov 128   ;;  %s268_s18 = smov 8  }
  0x16   :  { %31 = dma.hbm_to_vmem [thread:$0]  %s295_s1, 4096, %s26_s12, [#allocation6], %s267_s17, %s267_s17, %s268_s18  }
  0x17   :  { %259 = dma.done.wait [#allocation3], 256  }
  0x18   :  { %260 = vsyncadd [#allocation3], 4294967040 }
  0x19   :  { %261 = dma.done.wait [#allocation6], 4096  }
  0x1a   :  { %262 = vsyncadd [#allocation6], 4294963200  ;;  %v71_v0 = vld [vmem:[#allocation5 + $0xf8] sm:$0xff]  ;;  %v70_v2 = vld [vmem:[#allocation5 + $0xf0] sm:$0xff]  ;;  %s269_s0 = smov [#allocation7]  }
  0x1b   :  { %v55_v1 = vld [vmem:[#allocation5 + $0x78] sm:$0xff]  ;;  %159 = vmatprep.subr.mxu0 %v71_v0  ;;  %v54_v3 = vld [vmem:[#allocation5 + $0x70] sm:$0xff]  ;;  %v69_v4 = vld [vmem:[#allocation5 + $0xe8] sm:$0xff]  ;;  %s149_s1 = sshll.u32 %s269_s0, 4  ;;  %s150_s1 = int_to_ptr.vmem [resolvable:$true] %s149_s1 }
  0x1c   :  { %160 = vmatpush3.msra.mxu0 %v55_v1  ;;  %v53_v5 = vld [vmem:[#allocation5 + $0x68] sm:$0xff]  ;;  %v68_v6 = vld [vmem:[#allocation5 + $0xe0] sm:$0xff]  ;;  %v67_v8 = vld [vmem:[#allocation5 + $0xd8] sm:$0xff]  ;;  %s239_s21 = scalar_lea.vmem %s150_s1, 128  ;;  %p244_p11 = scmp.lt.s32.totalorder %s150_s1, %s150_s1 }
  0x1d   :  { %161 = vmatprep.subr.mxu0 %v70_v2  ;;  %v52_v7 = vld [vmem:[#allocation5 + $0x60] sm:$0xff]  ;;  %v51_v9 = vld [vmem:[#allocation5 + $0x58] sm:$0xff]  ;;  %v66_v10 = vld [vmem:[#allocation5 + $0xd0] sm:$0xff]  ;;  %p240_p10 = scmp.ne.s32.totalorder %s150_s1, %s239_s21  ;;  %p245_p12 = scmp.lt.s32.totalorder %s239_s21, %s239_s21 }
  0x1e   :  { %162 = vmatpush3.msra.mxu0 %v54_v3  ;;  %v50_v11 = vld [vmem:[#allocation5 + $0x50] sm:$0xff]  ;;  %v65_v12 = vld [vmem:[#allocation5 + $0xc8] sm:$0xff]  ;;  %v39_v13 = vld [vmem:[#allocation2 + $0x8] sm:$0xff] }
  0x1f   :  { %163 = vmatprep.subr.mxu0 %v69_v4  ;;  %v49_v14 = vld [vmem:[#allocation5 + $0x48] sm:$0xff]  ;;  %136 = vmatprep.mubr.f32.mxu0 %v39_v13  ;;  %v64_v15 = vld [vmem:[#allocation5 + $0xc0] sm:$0xff]  ;;  %v63_v17 = vld [vmem:[#allocation5 + $0xb8] sm:$0xff]  ;;  %p246_p13 = por %p245_p12, %p244_p11 }
  0x20   :  { %164 = vmatpush3.msra.mxu0 %v53_v5  ;;  %v48_v16 = vld [vmem:[#allocation5 + $0x40] sm:$0xff]  ;;  %v47_v18 = vld [vmem:[#allocation5 + $0x38] sm:$0xff]  ;;  %v62_v19 = vld [vmem:[#allocation5 + $0xb0] sm:$0xff] }
  0x21   :  { %165 = vmatprep.subr.mxu0 %v68_v6  ;;  %v46_v20 = vld [vmem:[#allocation5 + $0x30] sm:$0xff]  ;;  %v61_v21 = vld [vmem:[#allocation5 + $0xa8] sm:$0xff]  ;;  %v60_v23 = vld [vmem:[#allocation5 + $0xa0] sm:$0xff]  ;;  %p247_p0 = pnand %p246_p13, %p240_p10 }
  0x22   :  { %166 = vmatpush3.msra.mxu0 %v52_v7  ;;  %v45_v22 = vld [vmem:[#allocation5 + $0x28] sm:$0xff]  ;;  %v44_v24 = vld [vmem:[#allocation5 + $0x20] sm:$0xff]  ;;  %v59_v25 = vld [vmem:[#allocation5 + $0x98] sm:$0xff] }
  0x23   :  { %167 = vmatprep.subr.mxu0 %v67_v8  ;;  %v43_v26 = vld [vmem:[#allocation5 + $0x18] sm:$0xff]  ;;  %v58_v27 = vld [vmem:[#allocation5 + $0x90] sm:$0xff]  ;;  %v57_v29 = vld [vmem:[#allocation5 + $0x88] sm:$0xff] }
  0x24   :  { %168 = vmatpush3.msra.mxu0 %v51_v9  ;;  %v42_v28 = vld [vmem:[#allocation5 + $0x10] sm:$0xff]  ;;  %v41_v30 = vld [vmem:[#allocation5 + $0x8] sm:$0xff]  ;;  %v56_v31 = vld [vmem:[#allocation5 + $0x80] sm:$0xff] }
  0x25   :  { %169 = vmatprep.subr.mxu0 %v66_v10  ;;  %v40_v32 = vld [vmem:[#allocation5] sm:$0xff]  ;;  %v38_v33 = vld [vmem:[#allocation2] sm:$0xff] }
  0x26   :  { %170 = vmatpush3.msra.mxu0 %v50_v11 }
  0x27   :  { %171 = vmatprep.subr.mxu0 %v65_v12 }
  0x28   :  { %172 = vmatpush3.msra.mxu0 %v49_v14 }
  0x29   :  { %173 = vmatprep.subr.mxu0 %v64_v15 }
  0x2a   :  { %174 = vmatpush3.msra.mxu0 %v48_v16 }
  0x2b   :  { %175 = vmatprep.subr.mxu0 %v63_v17 }
  0x2c   :  { %176 = vmatpush3.msra.mxu0 %v47_v18 }
  0x2d   :  { %177 = vmatprep.subr.mxu0 %v62_v19 }
  0x2e   :  { %178 = vmatpush3.msra.mxu0 %v46_v20 }
  0x2f   :  { %179 = vmatprep.subr.mxu0 %v61_v21 }
  0x30   :  { %180 = vmatpush3.msra.mxu0 %v45_v22 }
  0x31   :  { %181 = vmatprep.subr.mxu0 %v60_v23 }
  0x32   :  { %182 = vmatpush3.msra.mxu0 %v44_v24 }
  0x33   :  { %183 = vmatprep.subr.mxu0 %v59_v25 }
  0x34   :  { %184 = vmatpush3.msra.mxu0 %v43_v26 }
  0x35   :  { %185 = vmatprep.subr.mxu0 %v58_v27 }
  0x36   :  { %186 = vmatpush3.msra.mxu0 %v42_v28 }
  0x37   :  { %187 = vmatprep.subr.mxu0 %v57_v29 }
  0x38   :  { %188 = vmatpush3.msra.mxu0 %v41_v30 }
  0x39   :  { %189 = vmatprep.subr.mxu0 %v56_v31 }
  0x3a   :  { %190 = vmatpush3.msra.mxu0 %v40_v32 }
  0x3b   :  { %137 = vmatmul.mubr.f32.vlgmr.msra.gmra.mxu0 %v38_v33 }
  0xfb   :  { %v191_v34 = vpop.f32.mrf.mxu0 }
  0xfd   :  { %v192_v35 = vpop.f32.mrf.mxu0 }
  0xfe   :  { %v193_v36 = vadd.f32 %v192_v35, %v191_v34 }
 0x100   :  { %142 = vst [vmem:[#allocation7] sm:$0xff] %v193_v36 }
 0x101   :  { %250 = shalt.err (!%p247_p0)
}
 0x102   :  { %152 = dma.vmem_to_hbm [thread:$0]  %s150_s1, 128, %s296_s2, [#allocation4]  }
 0x103   :  { %263 = dma.done.wait [#allocation4], 128  }
 0x104   :  { %264 = vsyncadd [#allocation4], 4294967168 }
 0x105   :  { %156 = vsyncpa [#allocation3], 1 }
 0x106   :  { %157 = vsyncpa [#allocation6], 1 }
 0x107   :  { %158 = vsyncpa [#allocation4], 1 }

</bundles_post_ra>
